<compile_context>
chip_gen: v5e
topology: v5e:2x2
jax: 0.10.0
libtpu: 0.0.40
codegen_flags: <defaults>
</compile_context>

<pallas_src>
import jax
import jax.numpy as jnp
from jax.experimental import pallas as pl
from jax.experimental.pallas import tpu as pltpu


# ----------------------------- fused Pallas kernel ---------------------------

def _fused_kernel(dims, x_ref,
                  wb1_ref, sh1_ref, wb2_ref, sh2_ref,
                  w12_ref, b12_ref,
                  o_ref,
                  p1_s):
    """Whole binaryClassifier forward for one image (grid iterates over batch)."""
    (Hp1, n1), (Hp2, n2) = dims          # n = Wp * Cout (pooled lane width per block)

    def conv_bn_relu_pool(read_rows, wb_ref, sh_ref, Hp, n):
        # 4 strided row-window reads, shared by the two row-pooling parity branches.
        rows = [read_rows(r).astype(jnp.bfloat16) for r in range(4)]   # each (Hp, W*Cin)
        taps = [wb_ref[d] for d in range(3)]                           # each (W*Cin, 2n)

        def branch(ph):          # conv rows of parity ph, columns parity-grouped by pw
            acc = jnp.zeros((Hp, 2 * n), jnp.float32)
            for dh in range(3):
                acc = acc + jnp.dot(rows[ph + dh], taps[dh],
                                    preferred_element_type=jnp.float32)
            return acc

        rmax = jnp.maximum(branch(0), branch(1))        # height pooling (elementwise)
        cmax = jnp.maximum(rmax[:, :n], rmax[:, n:])    # width pooling (static lane slice)
        return jnp.maximum(cmax + sh_ref[...], 0.0)     # BN shift + ReLU (post-pool, exact)

    # conv block 1: strided row windows sliced straight off the input ref
    p1_s[...] = conv_bn_relu_pool(lambda r: x_ref[pl.ds(r, Hp1, 2), :],
                                  wb1_ref, sh1_ref, Hp1, n1)
    # TODO(synk): Dropout(p=0.3) is identity in eval mode; train-mode RNG masking not implemented.

    # conv block 2: strided row windows sliced off the VMEM scratch holding block-1's output
    p2 = conv_bn_relu_pool(lambda r: p1_s[pl.ds(r, Hp2, 2), :],
                           wb2_ref, sh2_ref, Hp2, n2)

    # flatten (NCHW order pre-folded into w12) + fused dense1∘dense2
    out = b12_ref[...]                                  # (1, 2)
    for hp in range(Hp2):
        out = out + jnp.dot(p2[hp:hp + 1, :], w12_ref[hp],
                            preferred_element_type=jnp.float32)
    o_ref[...] = out.astype(o_ref.dtype)


# ----------------------- wrapper-side constant folding ------------------------

def _fold_bn(gamma, beta, mean, var, eps=1e-5):
    scale = gamma / jnp.sqrt(var + eps)
    shift = beta - mean * scale
    return scale, shift


def _conv_block_constants(w, gamma, beta, mean, var, H, W):
    """Constants for one Conv2d(3x3,bias=False)+BatchNorm(eval)+ReLU+MaxPool2d(2) block."""
    Cout, Cin = w.shape[0], w.shape[1]
    Ho, Wo = H - 2, W - 2
    Hp, Wp = Ho // 2, Wo // 2
    scale, shift = _fold_bn(gamma, beta, mean, var)

    # Banded conv weights with BN scale folded in; output columns grouped by the
    # width-pooling parity pw so the kernel's col pooling is a static lane slice:
    #   wb[dh, w_in*Cin + c, pw*(Wp*Cout) + wp*Cout + o]
    #       = W[o, c, dh, w_in - (2*wp + pw)] * scale[o]   (0 <= w_in-(2wp+pw) <= 2)
    w_tap = jnp.transpose(w * scale[:, None, None, None], (2, 3, 1, 0))    # (3,3,Cin,Cout) [dh,dw,c,o]
    sel = (jnp.arange(W)[None, None, :, None] ==
           (jnp.arange(3)[:, None, None, None]                            # dw
            + jnp.arange(2)[None, :, None, None]                          # pw
            + 2 * jnp.arange(Wp)[None, None, None, :])).astype(jnp.float32)  # (3,2,W,Wp)
    wb = jnp.einsum("eqaw,heco->hacqwo", sel, w_tap)                       # (3,W,Cin,2,Wp,Cout)
    wb = wb.reshape(3, W * Cin, 2 * Wp * Cout).astype(jnp.bfloat16)

    # BN shift in the pooled (hp, wp*Cout + o) layout (applied post-pool, pre-ReLU).
    sh = jnp.tile(shift, (Wp,)).reshape(1, Wp * Cout).astype(jnp.float32)

    return dict(wb=wb, sh=sh, Hp=Hp, Wp=Wp, Cout=Cout)


# --------------------------------- forward ------------------------------------

def binary_classifier_forward(params, x_nchw):
    """Forward pass of binaryClassifier (eval mode). x_nchw: (N, C_in, H, W)."""
    N, C1, H1, W1 = x_nchw.shape
    assert len(params["conv"]) == 2, "fused kernel is specialized to the 2-conv-block config"

    # NHWC, then merge (w, c) onto the lane axis: per-image activation is (H, W*C).
    x2d = jnp.transpose(x_nchw, (0, 2, 3, 1)).reshape(N, H1, W1 * C1)

    blk1, blk2 = params["conv"]
    k1 = _conv_block_constants(blk1["w"], blk1["gamma"], blk1["beta"],
                               blk1["mean"], blk1["var"], H1, W1)
    H2, W2 = k1["Hp"], k1["Wp"]
    k2 = _conv_block_constants(blk2["w"], blk2["gamma"], blk2["beta"],
                               blk2["mean"], blk2["var"], H2, W2)
    C2, C3 = k1["Cout"], k2["Cout"]
    Hp2, Wp2 = k2["Hp"], k2["Wp"]

    # dense2(dense1(x)) has no intervening nonlinearity -> fold into a single linear
    # map (exact algebra) and reorder its input rows from PyTorch NCHW-flatten order
    # (c*Hp2*Wp2 + hp*Wp2 + wp) to the kernel's (hp, wp*C3 + c) activation layout.
    w12 = params["w2"] @ params["w1"]                                      # (2, base_in_features)
    b12 = (params["w2"] @ params["b1"] + params["b2"]).reshape(1, -1).astype(jnp.float32)
    w12r = jnp.transpose(w12.reshape(-1, C3, Hp2, Wp2), (2, 3, 1, 0))
    w12r = w12r.reshape(Hp2, Wp2 * C3, -1).astype(jnp.float32)             # (Hp2, Wp2*C3, 2)

    dims = ((k1["Hp"], k1["Wp"] * C2), (Hp2, Wp2 * C3))

    def kernel(*refs):
        _fused_kernel(dims, *refs)

    consts = [k1["wb"], k1["sh"], k2["wb"], k2["sh"], w12r, b12]

    def full_spec(arr):
        nd = arr.ndim
        return pl.BlockSpec(arr.shape, lambda n, _nd=nd: (0,) * _nd)

    out3 = pl.pallas_call(
        kernel,
        out_shape=jax.ShapeDtypeStruct((N, 1, 2), jnp.float32),
        grid=(N,),
        in_specs=[pl.BlockSpec((None, H1, W1 * C1), lambda n: (n, 0, 0))]
                 + [full_spec(c) for c in consts],
        out_specs=pl.BlockSpec((None, 1, 2), lambda n: (n, 0, 0)),
        scratch_shapes=[
            pltpu.VMEM((H2, W2 * C2), jnp.float32),     # pooled block-1 activation
        ],
        compiler_params=pltpu.CompilerParams(
            dimension_semantics=("parallel",),
        ),
    )(x2d, *consts)
    return out3.reshape(N, 2)


# --------------------------- synthetic parameters ------------------------------

def init_params(cfg, key):
    """Deterministic synthetic parameters in PyTorch shape conventions."""
    params = {"conv": []}
    for i in range(cfg["num_conv_blocks"]):
        cin = cfg["in_channels"] if i == 0 else cfg["channels"][i][0]
        cout = cfg["channels"][i][1]
        key, k_w, k_g, k_b, k_m, k_v = jax.random.split(key, 6)
        w = jax.random.normal(k_w, (cout, cin, 3, 3), jnp.float32) * 0.1   # Conv2d (O,C,3,3), bias=False
        gamma = 1.0 + 0.1 * jax.random.normal(k_g, (cout,), jnp.float32)
        beta = 0.1 * jax.random.normal(k_b, (cout,), jnp.float32)
        mean = 0.05 * jax.random.normal(k_m, (cout,), jnp.float32)
        var = 1.0 + 0.1 * jax.random.uniform(k_v, (cout,), jnp.float32)
        params["conv"].append(dict(w=w, gamma=gamma, beta=beta, mean=mean, var=var))
    key, k1, k1b, k2, k2b = jax.random.split(key, 5)
    params["w1"] = jax.random.normal(k1, (10, cfg["base_in_features"]), jnp.float32) * 0.05  # Linear (out,in)
    params["b1"] = 0.01 * jax.random.normal(k1b, (10,), jnp.float32)
    params["w2"] = jax.random.normal(k2, (2, 10), jnp.float32) * 0.1
    params["b2"] = 0.01 * jax.random.normal(k2b, (2,), jnp.float32)
    return params


# --------------------------------- main ----------------------------------------

if __name__ == "__main__":
    cfg = {
        "num_conv_blocks": 2,
        "in_channels": 4,
        "channels": [[4, 8], [8, 16]],
        # 16x16 input: conv3->14, pool->7, conv3->5, pool->2  => 16*2*2 = 64
        "base_in_features": 64,
    }

    key = jax.random.PRNGKey(0)
    k_params, k_x = jax.random.split(key)
    params = init_params(cfg, k_params)

    x = jax.random.normal(k_x, (2, 4, 16, 16), jnp.float32)  # NCHW, PyTorch convention

    fwd = jax.jit(binary_classifier_forward)
    out = jax.block_until_ready(fwd(params, x))
    assert out.shape == (2, 2), out.shape
    assert out.dtype == jnp.float32
    print("KERNEL_OK")
</pallas_src>

<mosaic_0001>
module attributes {stable_mosaic.version = 11 : i64} {
  func.func @kernel(%arg0: i32, %arg1: memref<1x16x64xf32, #tpu.memory_space<vmem>>, %arg2: memref<3x64x112xbf16, #tpu.memory_space<vmem>>, %arg3: memref<1x56xf32, #tpu.memory_space<vmem>>, %arg4: memref<3x56x64xbf16, #tpu.memory_space<vmem>>, %arg5: memref<1x32xf32, #tpu.memory_space<vmem>>, %arg6: memref<2x32x2xf32, #tpu.memory_space<vmem>>, %arg7: memref<1x2xf32, #tpu.memory_space<vmem>>, %arg8: memref<1x1x2xf32, #tpu.memory_space<vmem>>, %arg9: memref<7x56xf32, #tpu.memory_space<vmem>>) attributes {dimension_semantics = [#tpu.dimension_semantics<parallel>], iteration_bounds = array<i64: 2>, scalar_prefetch = 0 : i64, scratch_operands = 1 : i64, tpu.core_type = #tpu.core_type<tc>, window_params = [{transform_indices = @transform_0, window_bounds = array<i64: 1, 16, 64>}, {pipeline_mode = #tpu.pipeline_mode<synchronous>, transform_indices = @transform_1, window_bounds = array<i64: 3, 64, 112>}, {pipeline_mode = #tpu.pipeline_mode<synchronous>, transform_indices = @transform_2, window_bounds = array<i64: 1, 56>}, {pipeline_mode = #tpu.pipeline_mode<synchronous>, transform_indices = @transform_3, window_bounds = array<i64: 3, 56, 64>}, {pipeline_mode = #tpu.pipeline_mode<synchronous>, transform_indices = @transform_4, window_bounds = array<i64: 1, 32>}, {pipeline_mode = #tpu.pipeline_mode<synchronous>, transform_indices = @transform_5, window_bounds = array<i64: 2, 32, 2>}, {pipeline_mode = #tpu.pipeline_mode<synchronous>, transform_indices = @transform_6, window_bounds = array<i64: 1, 2>}, {transform_indices = @transform_7, window_bounds = array<i64: 1, 1, 2>}]} {
    %c0 = arith.constant 0 : index
    %c0_0 = arith.constant 0 : index
    %c0_1 = arith.constant 0 : index
    %0 = tpu.strided_load %arg1[%c0, %c0_0, %c0_1] {strides = array<i32: 1, 2, 1>} : memref<1x16x64xf32, #tpu.memory_space<vmem>>, vector<1x7x64xf32>
    %1 = vector.shape_cast %0 : vector<1x7x64xf32> to vector<7x64xf32>
    %2 = arith.truncf %1 : vector<7x64xf32> to vector<7x64xbf16>
    %c0_2 = arith.constant 0 : index
    %c1 = arith.constant 1 : index
    %c0_3 = arith.constant 0 : index
    %3 = tpu.strided_load %arg1[%c0_2, %c1, %c0_3] {strides = array<i32: 1, 2, 1>} : memref<1x16x64xf32, #tpu.memory_space<vmem>>, vector<1x7x64xf32>
    %4 = vector.shape_cast %3 : vector<1x7x64xf32> to vector<7x64xf32>
    %5 = arith.truncf %4 : vector<7x64xf32> to vector<7x64xbf16>
    %c0_4 = arith.constant 0 : index
    %c2 = arith.constant 2 : index
    %c0_5 = arith.constant 0 : index
    %6 = tpu.strided_load %arg1[%c0_4, %c2, %c0_5] {strides = array<i32: 1, 2, 1>} : memref<1x16x64xf32, #tpu.memory_space<vmem>>, vector<1x7x64xf32>
    %7 = vector.shape_cast %6 : vector<1x7x64xf32> to vector<7x64xf32>
    %8 = arith.truncf %7 : vector<7x64xf32> to vector<7x64xbf16>
    %c0_6 = arith.constant 0 : index
    %c3 = arith.constant 3 : index
    %c0_7 = arith.constant 0 : index
    %9 = tpu.strided_load %arg1[%c0_6, %c3, %c0_7] {strides = array<i32: 1, 2, 1>} : memref<1x16x64xf32, #tpu.memory_space<vmem>>, vector<1x7x64xf32>
    %10 = vector.shape_cast %9 : vector<1x7x64xf32> to vector<7x64xf32>
    %11 = arith.truncf %10 : vector<7x64xf32> to vector<7x64xbf16>
    %c0_8 = arith.constant 0 : index
    %c0_9 = arith.constant 0 : index
    %c0_10 = arith.constant 0 : index
    %12 = vector.load %arg2[%c0_8, %c0_9, %c0_10] : memref<3x64x112xbf16, #tpu.memory_space<vmem>>, vector<1x64x112xbf16>
    %13 = vector.shape_cast %12 : vector<1x64x112xbf16> to vector<64x112xbf16>
    %c1_11 = arith.constant 1 : index
    %c0_12 = arith.constant 0 : index
    %c0_13 = arith.constant 0 : index
    %14 = vector.load %arg2[%c1_11, %c0_12, %c0_13] : memref<3x64x112xbf16, #tpu.memory_space<vmem>>, vector<1x64x112xbf16>
    %15 = vector.shape_cast %14 : vector<1x64x112xbf16> to vector<64x112xbf16>
    %c2_14 = arith.constant 2 : index
    %c0_15 = arith.constant 0 : index
    %c0_16 = arith.constant 0 : index
    %16 = vector.load %arg2[%c2_14, %c0_15, %c0_16] : memref<3x64x112xbf16, #tpu.memory_space<vmem>>, vector<1x64x112xbf16>
    %17 = vector.shape_cast %16 : vector<1x64x112xbf16> to vector<64x112xbf16>
    %cst = arith.constant 0.000000e+00 : f32
    %18 = vector.broadcast %cst : f32 to vector<7x112xf32>
    %cst_17 = arith.constant dense<0.000000e+00> : vector<7x112xf32>
    %19 = tpu.matmul %2, %13, %cst_17 {dimension_numbers = #tpu.dot_dimension_numbers<[1], [0], [0], [1], [0, 0, 1, 1], [], []>} : vector<7x64xbf16>, vector<64x112xbf16>, vector<7x112xf32> -> vector<7x112xf32>
    %20 = arith.addf %18, %19 : vector<7x112xf32>
    %cst_18 = arith.constant dense<0.000000e+00> : vector<7x112xf32>
    %21 = tpu.matmul %5, %15, %cst_18 {dimension_numbers = #tpu.dot_dimension_numbers<[1], [0], [0], [1], [0, 0, 1, 1], [], []>} : vector<7x64xbf16>, vector<64x112xbf16>, vector<7x112xf32> -> vector<7x112xf32>
    %22 = arith.addf %20, %21 : vector<7x112xf32>
    %cst_19 = arith.constant dense<0.000000e+00> : vector<7x112xf32>
    %23 = tpu.matmul %8, %17, %cst_19 {dimension_numbers = #tpu.dot_dimension_numbers<[1], [0], [0], [1], [0, 0, 1, 1], [], []>} : vector<7x64xbf16>, vector<64x112xbf16>, vector<7x112xf32> -> vector<7x112xf32>
    %24 = arith.addf %22, %23 : vector<7x112xf32>
    %cst_20 = arith.constant 0.000000e+00 : f32
    %25 = vector.broadcast %cst_20 : f32 to vector<7x112xf32>
    %cst_21 = arith.constant dense<0.000000e+00> : vector<7x112xf32>
    %26 = tpu.matmul %5, %13, %cst_21 {dimension_numbers = #tpu.dot_dimension_numbers<[1], [0], [0], [1], [0, 0, 1, 1], [], []>} : vector<7x64xbf16>, vector<64x112xbf16>, vector<7x112xf32> -> vector<7x112xf32>
    %27 = arith.addf %25, %26 : vector<7x112xf32>
    %cst_22 = arith.constant dense<0.000000e+00> : vector<7x112xf32>
    %28 = tpu.matmul %8, %15, %cst_22 {dimension_numbers = #tpu.dot_dimension_numbers<[1], [0], [0], [1], [0, 0, 1, 1], [], []>} : vector<7x64xbf16>, vector<64x112xbf16>, vector<7x112xf32> -> vector<7x112xf32>
    %29 = arith.addf %27, %28 : vector<7x112xf32>
    %cst_23 = arith.constant dense<0.000000e+00> : vector<7x112xf32>
    %30 = tpu.matmul %11, %17, %cst_23 {dimension_numbers = #tpu.dot_dimension_numbers<[1], [0], [0], [1], [0, 0, 1, 1], [], []>} : vector<7x64xbf16>, vector<64x112xbf16>, vector<7x112xf32> -> vector<7x112xf32>
    %31 = arith.addf %29, %30 : vector<7x112xf32>
    %32 = arith.maximumf %24, %31 : vector<7x112xf32>
    %33 = vector.extract_strided_slice %32 {offsets = [0, 0], sizes = [7, 56], strides = [1, 1]} : vector<7x112xf32> to vector<7x56xf32>
    %34 = vector.extract_strided_slice %32 {offsets = [0, 56], sizes = [7, 56], strides = [1, 1]} : vector<7x112xf32> to vector<7x56xf32>
    %35 = arith.maximumf %33, %34 : vector<7x56xf32>
    %c0_24 = arith.constant 0 : index
    %c0_25 = arith.constant 0 : index
    %36 = vector.load %arg3[%c0_24, %c0_25] : memref<1x56xf32, #tpu.memory_space<vmem>>, vector<1x56xf32>
    %37 = vector.broadcast %36 : vector<1x56xf32> to vector<7x56xf32>
    %38 = arith.addf %35, %37 : vector<7x56xf32>
    %cst_26 = arith.constant 0.000000e+00 : f32
    %39 = vector.broadcast %cst_26 : f32 to vector<7x56xf32>
    %40 = arith.maximumf %38, %39 : vector<7x56xf32>
    %c0_27 = arith.constant 0 : index
    %c0_28 = arith.constant 0 : index
    %41 = vector.load %arg9[%c0_27, %c0_28] : memref<7x56xf32, #tpu.memory_space<vmem>>, vector<7x56xf32>
    tpu.vector_store %arg9[%c0_27, %c0_28], %40 {strides = array<i32>} : memref<7x56xf32, #tpu.memory_space<vmem>>, vector<7x56xf32>,
    %c0_29 = arith.constant 0 : index
    %c0_30 = arith.constant 0 : index
    %42 = tpu.strided_load %arg9[%c0_29, %c0_30] {strides = array<i32: 2, 1>} : memref<7x56xf32, #tpu.memory_space<vmem>>, vector<2x56xf32>
    %43 = arith.truncf %42 : vector<2x56xf32> to vector<2x56xbf16>
    %c1_31 = arith.constant 1 : index
    %c0_32 = arith.constant 0 : index
    %44 = tpu.strided_load %arg9[%c1_31, %c0_32] {strides = array<i32: 2, 1>} : memref<7x56xf32, #tpu.memory_space<vmem>>, vector<2x56xf32>
    %45 = arith.truncf %44 : vector<2x56xf32> to vector<2x56xbf16>
    %c2_33 = arith.constant 2 : index
    %c0_34 = arith.constant 0 : index
    %46 = tpu.strided_load %arg9[%c2_33, %c0_34] {strides = array<i32: 2, 1>} : memref<7x56xf32, #tpu.memory_space<vmem>>, vector<2x56xf32>
    %47 = arith.truncf %46 : vector<2x56xf32> to vector<2x56xbf16>
    %c3_35 = arith.constant 3 : index
    %c0_36 = arith.constant 0 : index
    %48 = tpu.strided_load %arg9[%c3_35, %c0_36] {strides = array<i32: 2, 1>} : memref<7x56xf32, #tpu.memory_space<vmem>>, vector<2x56xf32>
    %49 = arith.truncf %48 : vector<2x56xf32> to vector<2x56xbf16>
    %c0_37 = arith.constant 0 : index
    %c0_38 = arith.constant 0 : index
    %c0_39 = arith.constant 0 : index
    %50 = vector.load %arg4[%c0_37, %c0_38, %c0_39] : memref<3x56x64xbf16, #tpu.memory_space<vmem>>, vector<1x56x64xbf16>
    %51 = vector.shape_cast %50 : vector<1x56x64xbf16> to vector<56x64xbf16>
    %c1_40 = arith.constant 1 : index
    %c0_41 = arith.constant 0 : index
    %c0_42 = arith.constant 0 : index
    %52 = vector.load %arg4[%c1_40, %c0_41, %c0_42] : memref<3x56x64xbf16, #tpu.memory_space<vmem>>, vector<1x56x64xbf16>
    %53 = vector.shape_cast %52 : vector<1x56x64xbf16> to vector<56x64xbf16>
    %c2_43 = arith.constant 2 : index
    %c0_44 = arith.constant 0 : index
    %c0_45 = arith.constant 0 : index
    %54 = vector.load %arg4[%c2_43, %c0_44, %c0_45] : memref<3x56x64xbf16, #tpu.memory_space<vmem>>, vector<1x56x64xbf16>
    %55 = vector.shape_cast %54 : vector<1x56x64xbf16> to vector<56x64xbf16>
    %cst_46 = arith.constant 0.000000e+00 : f32
    %56 = vector.broadcast %cst_46 : f32 to vector<2x64xf32>
    %cst_47 = arith.constant dense<0.000000e+00> : vector<2x64xf32>
    %57 = tpu.matmul %43, %51, %cst_47 {dimension_numbers = #tpu.dot_dimension_numbers<[1], [0], [0], [1], [0, 0, 1, 1], [], []>} : vector<2x56xbf16>, vector<56x64xbf16>, vector<2x64xf32> -> vector<2x64xf32>
    %58 = arith.addf %56, %57 : vector<2x64xf32>
    %cst_48 = arith.constant dense<0.000000e+00> : vector<2x64xf32>
    %59 = tpu.matmul %45, %53, %cst_48 {dimension_numbers = #tpu.dot_dimension_numbers<[1], [0], [0], [1], [0, 0, 1, 1], [], []>} : vector<2x56xbf16>, vector<56x64xbf16>, vector<2x64xf32> -> vector<2x64xf32>
    %60 = arith.addf %58, %59 : vector<2x64xf32>
    %cst_49 = arith.constant dense<0.000000e+00> : vector<2x64xf32>
    %61 = tpu.matmul %47, %55, %cst_49 {dimension_numbers = #tpu.dot_dimension_numbers<[1], [0], [0], [1], [0, 0, 1, 1], [], []>} : vector<2x56xbf16>, vector<56x64xbf16>, vector<2x64xf32> -> vector<2x64xf32>
    %62 = arith.addf %60, %61 : vector<2x64xf32>
    %cst_50 = arith.constant 0.000000e+00 : f32
    %63 = vector.broadcast %cst_50 : f32 to vector<2x64xf32>
    %cst_51 = arith.constant dense<0.000000e+00> : vector<2x64xf32>
    %64 = tpu.matmul %45, %51, %cst_51 {dimension_numbers = #tpu.dot_dimension_numbers<[1], [0], [0], [1], [0, 0, 1, 1], [], []>} : vector<2x56xbf16>, vector<56x64xbf16>, vector<2x64xf32> -> vector<2x64xf32>
    %65 = arith.addf %63, %64 : vector<2x64xf32>
    %cst_52 = arith.constant dense<0.000000e+00> : vector<2x64xf32>
    %66 = tpu.matmul %47, %53, %cst_52 {dimension_numbers = #tpu.dot_dimension_numbers<[1], [0], [0], [1], [0, 0, 1, 1], [], []>} : vector<2x56xbf16>, vector<56x64xbf16>, vector<2x64xf32> -> vector<2x64xf32>
    %67 = arith.addf %65, %66 : vector<2x64xf32>
    %cst_53 = arith.constant dense<0.000000e+00> : vector<2x64xf32>
    %68 = tpu.matmul %49, %55, %cst_53 {dimension_numbers = #tpu.dot_dimension_numbers<[1], [0], [0], [1], [0, 0, 1, 1], [], []>} : vector<2x56xbf16>, vector<56x64xbf16>, vector<2x64xf32> -> vector<2x64xf32>
    %69 = arith.addf %67, %68 : vector<2x64xf32>
    %70 = arith.maximumf %62, %69 : vector<2x64xf32>
    %71 = vector.extract_strided_slice %70 {offsets = [0, 0], sizes = [2, 32], strides = [1, 1]} : vector<2x64xf32> to vector<2x32xf32>
    %72 = vector.extract_strided_slice %70 {offsets = [0, 32], sizes = [2, 32], strides = [1, 1]} : vector<2x64xf32> to vector<2x32xf32>
    %73 = arith.maximumf %71, %72 : vector<2x32xf32>
    %c0_54 = arith.constant 0 : index
    %c0_55 = arith.constant 0 : index
    %74 = vector.load %arg5[%c0_54, %c0_55] : memref<1x32xf32, #tpu.memory_space<vmem>>, vector<1x32xf32>
    %75 = vector.broadcast %74 : vector<1x32xf32> to vector<2x32xf32>
    %76 = arith.addf %73, %75 : vector<2x32xf32>
    %cst_56 = arith.constant 0.000000e+00 : f32
    %77 = vector.broadcast %cst_56 : f32 to vector<2x32xf32>
    %78 = arith.maximumf %76, %77 : vector<2x32xf32>
    %c0_57 = arith.constant 0 : index
    %c0_58 = arith.constant 0 : index
    %79 = vector.load %arg7[%c0_57, %c0_58] : memref<1x2xf32, #tpu.memory_space<vmem>>, vector<1x2xf32>
    %80 = vector.extract_strided_slice %78 {offsets = [0, 0], sizes = [1, 32], strides = [1, 1]} : vector<2x32xf32> to vector<1x32xf32>
    %c0_59 = arith.constant 0 : index
    %c0_60 = arith.constant 0 : index
    %c0_61 = arith.constant 0 : index
    %81 = vector.load %arg6[%c0_59, %c0_60, %c0_61] : memref<2x32x2xf32, #tpu.memory_space<vmem>>, vector<1x32x2xf32>
    %82 = vector.shape_cast %81 : vector<1x32x2xf32> to vector<32x2xf32>
    %cst_62 = arith.constant dense<0.000000e+00> : vector<1x2xf32>
    %83 = tpu.matmul %80, %82, %cst_62 {dimension_numbers = #tpu.dot_dimension_numbers<[1], [0], [0], [1], [0, 0, 1, 1], [], []>} : vector<1x32xf32>, vector<32x2xf32>, vector<1x2xf32> -> vector<1x2xf32>
    %84 = arith.addf %79, %83 : vector<1x2xf32>
    %85 = vector.extract_strided_slice %78 {offsets = [1, 0], sizes = [1, 32], strides = [1, 1]} : vector<2x32xf32> to vector<1x32xf32>
    %c1_63 = arith.constant 1 : index
    %c0_64 = arith.constant 0 : index
    %c0_65 = arith.constant 0 : index
    %86 = vector.load %arg6[%c1_63, %c0_64, %c0_65] : memref<2x32x2xf32, #tpu.memory_space<vmem>>, vector<1x32x2xf32>
    %87 = vector.shape_cast %86 : vector<1x32x2xf32> to vector<32x2xf32>
    %cst_66 = arith.constant dense<0.000000e+00> : vector<1x2xf32>
    %88 = tpu.matmul %85, %87, %cst_66 {dimension_numbers = #tpu.dot_dimension_numbers<[1], [0], [0], [1], [0, 0, 1, 1], [], []>} : vector<1x32xf32>, vector<32x2xf32>, vector<1x2xf32> -> vector<1x2xf32>
    %89 = arith.addf %84, %88 : vector<1x2xf32>
    %c0_67 = arith.constant 0 : index
    %c0_68 = arith.constant 0 : index
    %c0_69 = arith.constant 0 : index
    %90 = vector.load %arg8[%c0_67, %c0_68, %c0_69] : memref<1x1x2xf32, #tpu.memory_space<vmem>>, vector<1x1x2xf32>
    %91 = vector.shape_cast %90 : vector<1x1x2xf32> to vector<1x2xf32>
    %92 = vector.shape_cast %89 : vector<1x2xf32> to vector<1x1x2xf32>
    tpu.vector_store %arg8[%c0_67, %c0_68, %c0_69], %92 {strides = array<i32>} : memref<1x1x2xf32, #tpu.memory_space<vmem>>, vector<1x1x2xf32>,
    return
  }
  func.func @transform_0(%arg0: i32) -> (i32, i32, i32) {
    %c0_i32 = arith.constant 0 : i32
    %c0_i32_0 = arith.constant 0 : i32
    %c0_i32_1 = arith.constant 0 : i32
    return %arg0, %c0_i32, %c0_i32_0 : i32, i32, i32
  }
  func.func @transform_1(%arg0: i32) -> (i32, i32, i32) {
    %c0_i32 = arith.constant 0 : i32
    %c0_i32_0 = arith.constant 0 : i32
    %c0_i32_1 = arith.constant 0 : i32
    %c0_i32_2 = arith.constant 0 : i32
    return %c0_i32, %c0_i32_0, %c0_i32_1 : i32, i32, i32
  }
  func.func @transform_2(%arg0: i32) -> (i32, i32) {
    %c0_i32 = arith.constant 0 : i32
    %c0_i32_0 = arith.constant 0 : i32
    %c0_i32_1 = arith.constant 0 : i32
    return %c0_i32, %c0_i32_0 : i32, i32
  }
  func.func @transform_3(%arg0: i32) -> (i32, i32, i32) {
    %c0_i32 = arith.constant 0 : i32
    %c0_i32_0 = arith.constant 0 : i32
    %c0_i32_1 = arith.constant 0 : i32
    %c0_i32_2 = arith.constant 0 : i32
    return %c0_i32, %c0_i32_0, %c0_i32_1 : i32, i32, i32
  }
  func.func @transform_4(%arg0: i32) -> (i32, i32) {
    %c0_i32 = arith.constant 0 : i32
    %c0_i32_0 = arith.constant 0 : i32
    %c0_i32_1 = arith.constant 0 : i32
    return %c0_i32, %c0_i32_0 : i32, i32
  }
  func.func @transform_5(%arg0: i32) -> (i32, i32, i32) {
    %c0_i32 = arith.constant 0 : i32
    %c0_i32_0 = arith.constant 0 : i32
    %c0_i32_1 = arith.constant 0 : i32
    %c0_i32_2 = arith.constant 0 : i32
    return %c0_i32, %c0_i32_0, %c0_i32_1 : i32, i32, i32
  }
  func.func @transform_6(%arg0: i32) -> (i32, i32) {
    %c0_i32 = arith.constant 0 : i32
    %c0_i32_0 = arith.constant 0 : i32
    %c0_i32_1 = arith.constant 0 : i32
    return %c0_i32, %c0_i32_0 : i32, i32
  }
  func.func @transform_7(%arg0: i32) -> (i32, i32, i32) {
    %c0_i32 = arith.constant 0 : i32
    %c0_i32_0 = arith.constant 0 : i32
    %c0_i32_1 = arith.constant 0 : i32
    return %arg0, %c0_i32, %c0_i32_0 : i32, i32, i32
  }
}

</mosaic_0001>

<bundles_post_ra>
// kernel: tile.13
= control target key start
LH: loop header
LB: loop body
LE: loop exit
PB: predicated region body
PF: predicated region fallthrough
CT: control target
= control target key end

     0   :  { %s22_s0 = inlined_call_operand.vmem [shape: f32[8], index: 0, kind: input, shape index: {}]   ;;  %s23_s1 = inlined_call_operand.vmem [shape: f32[7,8], index: 1, kind: output, shape index: {}]  }
   0x1   :  { %v4_v0 = vld [vmem:[%s22_s0] ss:$0 sm:$0xff] }
   0x2   :  { %5 = vst [vmem:[%s23_s1] sm:$0xff] %v4_v0 }

// kernel: tile.14
= control target key start
LH: loop header
LB: loop body
LE: loop exit
PB: predicated region body
PF: predicated region fallthrough
CT: control target
= control target key end

     0   :  { %s59_s10 = smov 48   ;;  %s60_s11 = smov 32   ;;  %vm3_vm0 = vcmask 64512   ;;  %vm9_vm1 = vcmask 458112   ;;  %vm15_vm2 = vcmask 392512   ;;  %vm21_vm3 = vcmask 326912   ;;  %s99_s0 = inlined_call_operand.vmem [shape: f32[7,8], index: 0, kind: input, shape index: {}]   ;;  %s100_s1 = inlined_call_operand.vmem [shape: f32[1,56], index: 1, kind: output, shape index: {}]  }
   0x1   :  { %v47_v0 = vld [vmem:[%s99_s0 + $0x6] sm:$0x1]   ;;  %v49_v1 = vld [vmem:[%s99_s0 + $0x4] sm:$0x1]   ;;  %v51_v2 = vld [vmem:[%s99_s0 + $0x2] sm:$0x1]  }
   0x2   :  { %7 = vrot.lane.b32.xlu0 %v47_v0, %s59_s10  ;;  %19 = vrot.lane.b32.xlu1 %v49_v1, %s60_s11  ;;  %s61_s14 = smov 16   ;;  %v48_v3 = vld [vmem:[%s99_s0 + $0x5] sm:$0x1]   ;;  %v50_v4 = vld [vmem:[%s99_s0 + $0x3] sm:$0x1]   ;;  %s62_s21 = smov 40  }
   0x3   :  { %31 = vrot.lane.b32.xlu2 %v51_v2, %s61_s14  ;;  %v52_v5 = vld [vmem:[%s99_s0 + $0x1] sm:$0x1]   ;;  %s63_s22 = smov 24   ;;  %s64_s23 = smov 8   ;;  %v2_v6 = vld [vmem:[%s99_s0] sm:$0x1]  }
   0x4   :  { %4 = vst.msk [vmem:[#allocation0] sm:$0x1] %vm3_vm0, %v2_v6   ;;  %vm27_vm4 = vcmask 261312   ;;  %vm33_vm5 = vcmask 195712   ;;  %vm39_vm6 = vcmask 130112  }
   0xa   :  { %13 = vrot.lane.b32.xlu0 %v48_v3, %s62_s21  ;;  %25 = vrot.lane.b32.xlu1 %v50_v4, %s63_s22 }
   0xb   :  { %37 = vrot.lane.b32.xlu2 %v52_v5, %s64_s23 }
  0x5d   :  { %v32_v7 = vpop.permute.xlu2 %31  }
  0x65   :  { %v38_v8 = vpop.permute.xlu2 %37  }
  0x74   :  { %v8_v9 = vpop.permute.xlu0 %7   ;;  %v20_v10 = vpop.permute.xlu1 %19  }
  0x75   :  { %10 = vst.msk [vmem:[#allocation0] sm:$0x1] %vm9_vm1, %v8_v9  }
  0x7c   :  { %v14_v11 = vpop.permute.xlu0 %13   ;;  %v26_v12 = vpop.permute.xlu1 %25  }
  0x7d   :  { %16 = vst.msk [vmem:[#allocation0] sm:$0x1] %vm15_vm2, %v14_v11  }
  0x7e   :  { %22 = vst.msk [vmem:[#allocation0] sm:$0x1] %vm21_vm3, %v20_v10  }
  0x7f   :  { %28 = vst.msk [vmem:[#allocation0] sm:$0x1] %vm27_vm4, %v26_v12  }
  0x80   :  { %34 = vst.msk [vmem:[#allocation0] sm:$0x1] %vm33_vm5, %v32_v7  }
  0x81   :  { %40 = vst.msk [vmem:[#allocation0] sm:$0x1] %vm39_vm6, %v38_v8  }
  0x88   :  { %v43_v13 = vld [vmem:[#allocation0] sm:$0x1] }
  0x89   :  { %46 = vst [vmem:[%s100_s1] sm:$0x1] %v43_v13 }

// kernel: tile.18
= control target key start
LH: loop header
LB: loop body
LE: loop exit
PB: predicated region body
PF: predicated region fallthrough
CT: control target
= control target key end

     0   :  { %s22_s0 = inlined_call_operand.vmem [shape: f32[16], index: 0, kind: input, shape index: {}]   ;;  %s23_s1 = inlined_call_operand.vmem [shape: f32[2,16], index: 1, kind: output, shape index: {}]  }
   0x1   :  { %v4_v0 = vld [vmem:[%s22_s0] ss:$0 sm:$0xff] }
   0x2   :  { %5 = vst [vmem:[%s23_s1] sm:$0x3] %v4_v0 }

// kernel: tile.19
= control target key start
LH: loop header
LB: loop body
LE: loop exit
PB: predicated region body
PF: predicated region fallthrough
CT: control target
= control target key end

     0   :  { %vm7_vm0 = vcmask 130048   ;;  %vm13_vm1 = vcmask 261248   ;;  %s39_s0 = inlined_call_operand.vmem [shape: f32[2,16], index: 0, kind: input, shape index: {}]   ;;  %s40_s1 = inlined_call_operand.vmem [shape: f32[1,32], index: 1, kind: output, shape index: {}]  }
   0x1   :  { %v4_v0 = vld [vmem:[%s39_s0] sm:$0x3]  ;;  %s22_s0 = smov 16  }
   0x2   :  { %5 = vst [vmem:[#allocation1] sm:$0x3] %v4_v0 }
   0x9   :  { %v10_v1 = vld [vmem:[#allocation1 + $0x1] sm:$0x1]   ;;  %v6_v2 = vld [vmem:[#allocation1] sm:$0x1]  }
   0xa   :  { %11 = vrot.lane.b32.xlu0 %v10_v1, %s22_s0  ;;  %8 = vst.msk [vmem:[#allocation0] sm:$0x1] %vm7_vm0, %v6_v2  }
  0x7c   :  { %v12_v3 = vpop.permute.xlu0 %11  }
  0x7d   :  { %14 = vst.msk [vmem:[#allocation0] sm:$0x1] %vm13_vm1, %v12_v3  }
  0x84   :  { %v17_v4 = vld [vmem:[#allocation0] sm:$0x1] }
  0x85   :  { %20 = vst [vmem:[%s40_s1] sm:$0x1] %v17_v4 }

// kernel: binary_classifier_forward.1
= control target key start
LH: loop header
LB: loop body
LE: loop exit
PB: predicated region body
PF: predicated region fallthrough
CT: control target
= control target key end

     0   :  { %12 = vsyncpa [#allocation4], 0  ;;  %s1344_s0 = inlined_call_operand.vmem [shape: f32[2,16,64], index: 0, kind: input, shape index: {}]   ;;  %s1345_s1 = inlined_call_operand.vmem [shape: bf16[3,64,112], index: 1, kind: input, shape index: {}]   ;;  %s1346_s2 = inlined_call_operand.vmem [shape: f32[1,56], index: 2, kind: input, shape index: {}]   ;;  %s1347_s3 = inlined_call_operand.vmem [shape: bf16[3,56,64], index: 3, kind: input, shape index: {}]   ;;  %s1348_s4 = inlined_call_operand.vmem [shape: f32[1,32], index: 4, kind: input, shape index: {}]   ;;  %s1349_s5 = inlined_call_operand.vmem [shape: f32[2,32,2], index: 5, kind: input, shape index: {}]   ;;  %s1350_s6 = inlined_call_operand.vmem [shape: f32[1,2], index: 6, kind: input, shape index: {}]   ;;  %s1351_s7 = inlined_call_operand.hbm [shape: f32[2,1,2], index: 7, kind: output, shape index: {}]  }
   0x1   :  { %14 = vsyncpa [#allocation4 + $0x1], 0  ;;  %s1148_s24 = smov 0   ;;  %s1150_s25 = smov 0  }
   0x2   :  { %s1152_s26 = smov 0   ;;  %s1154_s27 = smov 0  }
   0x3 LB: > { %s1169_s28 = sadd.s32 4294967295, %s1104_s27   ;;  %s834_s29 = sadd.s32 4294967294, %s1104_s27   ;;  %s1104_s27 = sphi %s1154_s27, %s1357_s27   ;;  %s1100_s26 = sphi %s1152_s26, %s1356_s26   ;;  %s1096_s25 = sphi %s1150_s25, %s1355_s25   ;;  %s1092_s24 = sphi %s1148_s24, %s1354_s24  }
   0x4   : > { %s1173_s30 = sadd.s32 1, %s1104_s27   ;;  %s179_s8 = sadd.s32 1, %s1100_s26 }
   0x5   : > { %s176_s9 = ssub.s32 %s1104_s27, %s1173_s30  ;;  %p189_p0 = scmp.ne.s32.totalorder %s1100_s26, %s1096_s25 }
   0x6   : > { %p177_p1 = scmp.eq.s32.totalorder %s176_s9, 0  ;;  %p190_p2 = scmp.eq.s32.totalorder %s1169_s28, 1 }
   0x7   : > { %p195_p3 = scmp.ne.s32.totalorder %s1096_s25, %s1092_s24  ;;  %p196_p4 = scmp.eq.s32.totalorder %s834_s29, 1 }
   0x8   : > { %s1184_s10 = scalar_select %p177_p1, %s1100_s26, %s179_s8  }
   0x9   : > { %p1186_p5 = por %p190_p2, %p189_p0  ;;  %p1190_p6 = por %p196_p4, %p195_p3 }
   0xa   : > { %p837_p7 = scmp.ge.s32.totalorder %s1104_s27, 1  ;;  %p240_p8 = scmp.lt.s32.totalorder %s1104_s27, 3 }
   0xc   : > { %p241_p9 = pnand %p837_p7, %p240_p8 }
   0xd   : > { %p271_p10 = scmp.lt.s32.totalorder (!%p241_p9), %s1169_s28, 1  ;;  %s269_s18 = sand.u32 (!%p241_p9), 1, %s1096_s25  }
   0xe   : > { %244 = sbr.rel (%p241_p9) target bundleno = 722 (0x2d2), region = 48  ;;  %s270_s29 = scalar_lea.vmem (!%p241_p9), [#allocation3], %s269_s18 }
   0xf   : > { %s777_s8 = sshll.u32 (!%p241_p9), %s270_s29, 4  ;;  %s767_s14 = scalar_lea.sflag (!%p241_p9), [#allocation4], %s269_s18  ;;  %s778_s8 = int_to_ptr.vmem [resolvable:$true] %s777_s8 }
  0x10   : > { %s1062_s17 = scalar_lea.hbm (!%p241_p9), %s1351_s7, 2 }
  0x13   : > { %v985_v0 = vld [vmem:[%s1345_s1 + $0x38] sm:$0xff]  ;;  %v984_v3 = vld [vmem:[%s1345_s1 + $0x30] sm:$0xff]  ;;  %s272_s23 = scalar_select %p271_p10, %s1169_s28, 1  ;;  %v983_v6 = vld [vmem:[%s1345_s1 + $0x28] sm:$0xff]  ;;  %vm338_vm0 = vcmask 523264   ;;  %vm552_vm1 = vcmask 1043456  }
  0x14   : > { %v981_v1 = vld [vmem:[%s1345_s1 + $0x18] sm:$0xff]  ;;  %346 = vmatpush.bf16.msra.mxu0 %v985_v0  ;;  %v980_v4 = vld [vmem:[%s1345_s1 + $0x10] sm:$0xff]  ;;  %440 = vmatpush.bf16.msra.mxu3 %v985_v0  ;;  %v979_v7 = vld [vmem:[%s1345_s1 + $0x8] sm:$0xff]  ;;  %vm491_vm2 = vcmask 456704   ;;  %vm548_vm3 = vcmask 457728   ;;  %vm710_vm4 = vcmask 261120  }
  0x15   : > { %v989_v2 = vld [vmem:[%s1345_s1 + $0x58] sm:$0xff]  ;;  %386 = vmatpush.bf16.msra.mxu1 %v981_v1  ;;  %v988_v5 = vld [vmem:[%s1345_s1 + $0x50] sm:$0xff]  ;;  %s977_s9 = sshll.u32 %s272_s23, 4  ;;  %v987_v8 = vld [vmem:[%s1345_s1 + $0x48] sm:$0xff]  ;;  %s1107_s23 = smov 96   ;;  %vm764_vm5 = vcmask 8192  }
  0x16   : > { %426 = vmatpush.bf16.msra.mxu2 %v989_v2  ;;  %s275_s21 = scalar_lea.vmem %s1344_s0, %s977_s9  ;;  %v982_v9 = vld [vmem:[%s1345_s1 + $0x20] sm:$0xff]  ;;  %s1106_s9 = smov 72   ;;  %v919_v37 = vld [vmem:[%s1347_s3 + $0x34] sm:$0xf]  ;;  %v510_v38 = vld [vmem:[%s1347_s3 + $0x18] sm:$0xf] }
  0x17   : > { %v978_v10 = vld [vmem:[%s1345_s1] sm:$0xff]  ;;  %v926_v39 = vld [vmem:[%s1347_s3 + $0x50] sm:$0xf]  ;;  %v540_v40 = vunpack.c.l.b16 %v919_v37  ;;  %v582_v41 = vunpack.c.l.b16 %v510_v38  ;;  %v998_v51 = vld [vmem:[%s1347_s3 + $0x48] sm:$0xff] }
  0x18   : > { %347 = vmatpush.bf16.msra.mxu0 %v984_v3  ;;  %441 = vmatpush.bf16.msra.mxu3 %v984_v3  ;;  %v840_v11 = vld [vmem:[%s275_s21 + $0x1] ss:$2 sm:$0x7f]  ;;  %v277_v12 = vld [vmem:[%s275_s21] ss:$2 sm:$0x7f]  ;;  %v622_v42 = vunpack.c.l.b16 %v926_v39 }
  0x19   : > { %387 = vmatpush.bf16.msra.mxu1 %v980_v4  ;;  %v986_v13 = vld [vmem:[%s1345_s1 + $0x40] sm:$0xff]  ;;  %v281_v15 = vpack.c.bf16 %v840_v11, %v840_v11  ;;  %v278_v16 = vpack.c.bf16 %v277_v12, %v277_v12  ;;  %v544_v43 = vpack.c.b16 %v540_v40, %v540_v40  ;;  %v586_v44 = vpack.c.b16 %v582_v41, %v582_v41  ;;  %v995_v49 = vld [vmem:[%s1347_s3 + $0x2c] sm:$0xff]  ;;  %v996_v57 = vld [vmem:[%s1347_s3 + $0x38] sm:$0xff] }
  0x1a   : > { %427 = vmatpush.bf16.msra.mxu2 %v988_v5  ;;  %v841_v14 = vld [vmem:[%s275_s21 + $0x2] ss:$2 sm:$0x7f]  ;;  %v842_v18 = vld [vmem:[%s275_s21 + $0x3] ss:$2 sm:$0x7f]  ;;  %v626_v45 = vpack.c.b16 %v622_v42, %v622_v42  ;;  %s775_s21 = scalar_lea.hbm %s1351_s7, %s1169_s28 }
  0x1b   : > { %v284_v17 = vpack.c.bf16 %v841_v14, %v841_v14  ;;  %v287_v19 = vpack.c.bf16 %v842_v18, %v842_v18  ;;  %v554_v46 = vsel %vm552_vm1, %v544_v43, 0  ;;  %v594_v47 = vsel %vm552_vm1, %v586_v44, 0  ;;  %v992_v50 = vld [vmem:[%s1347_s3 + $0x10] sm:$0xff]  ;;  %v994_v52 = vld [vmem:[%s1347_s3 + $0x24] sm:$0xff]  ;;  %v993_v55 = vld [vmem:[%s1347_s3 + $0x1c] sm:$0xff]  ;;  %s779_s13 = sshll.u32 %s775_s21, 4  ;;  %s780_s13 = int_to_ptr.hbm [resolvable:$true] %s779_s13 }
  0x1c   : > { %348 = vmatpush.bf16.msra.mxu0 %v983_v6  ;;  %442 = vmatpush.bf16.msra.mxu3 %v983_v6  ;;  %v634_v48 = vsel %vm552_vm1, %v626_v45, 0  ;;  %v991_v53 = vld [vmem:[%s1347_s3 + $0x8] sm:$0xff]  ;;  %v997_v54 = vld [vmem:[%s1347_s3 + $0x40] sm:$0xff] }
  0x1d   : > { %388 = vmatpush.bf16.msra.mxu1 %v979_v7  ;;  %v990_v56 = vld [vmem:[%s1347_s3] sm:$0xff]  ;;  %v707_v11 = vld [vmem:[%s1349_s5 + $0x8] sm:$0xff] }
  0x1e   : > { %428 = vmatpush.bf16.msra.mxu2 %v987_v8  ;;  %v1040_v58 = vld [vmem:[%s1346_s2] ss:$0 sm:$0xff] }
  0x1f   : > { %v705_v38 = vld [vmem:[%s1350_s6] sm:$0x1] }
  0x20   : > { %349 = vmatpush.bf16.msra.mxu0 %v982_v9  ;;  %443 = vmatpush.bf16.msra.mxu3 %v982_v9  ;;  %v708_v9 = vld [vmem:[%s1349_s5 + $0x10] sm:$0xff] }
  0x21   : > { %389 = vmatpush.bf16.msra.mxu1 %v978_v10 }
  0x22   : > { %429 = vmatpush.bf16.msra.mxu2 %v986_v13 }
  0x23   : > { %875 = vmatmul.msk.bf16.vlgmr.msra.gmra.mxu0 %vm338_vm0, %v281_v15  ;;  %910 = vmatmul.msk.bf16.vlgmr.msra.gmra.mxu3 %vm338_vm0, %v284_v17 }
  0x24   : > { %453 = vmatpush.bf16.msrb.mxu0 %v981_v1  ;;  %892 = vmatmul.msk.bf16.vlgmr.msra.gmra.mxu1 %vm338_vm0, %v278_v16 }
  0x25   : > { %469 = vmatpush.bf16.msrb.mxu1 %v989_v2  ;;  %909 = vmatmul.msk.bf16.vlgmr.msra.gmra.mxu2 %vm338_vm0, %v284_v17 }
  0x26   : > { %560 = vmatpush.bf16.msrb.mxu2 %v554_v46  ;;  %600 = vmatpush.bf16.msrb.mxu3 %v594_v47 }
  0x28   : > { %454 = vmatpush.bf16.msrb.mxu0 %v980_v4 }
  0x29   : > { %470 = vmatpush.bf16.msrb.mxu1 %v988_v5 }
  0x2a   : > { %561 = vmatpush.bf16.msrb.mxu2 %v995_v49  ;;  %601 = vmatpush.bf16.msrb.mxu3 %v992_v50 }
  0x2c   : > { %455 = vmatpush.bf16.msrb.mxu0 %v979_v7  ;;  %v709_v7 = vld [vmem:[%s1349_s5 + $0x18] sm:$0xff] }
  0x2d   : > { %471 = vmatpush.bf16.msrb.mxu1 %v987_v8  ;;  %v973_v8 = vld [vmem:[%s1349_s5 + $0x38] sm:$0xff] }
  0x2e   : > { %562 = vmatpush.bf16.msrb.mxu2 %v994_v52  ;;  %602 = vmatpush.bf16.msrb.mxu3 %v991_v53 }
  0x30   : > { %456 = vmatpush.bf16.msrb.mxu0 %v978_v10  ;;  %v972_v10 = vld [vmem:[%s1349_s5 + $0x30] sm:$0xff] }
  0x31   : > { %472 = vmatpush.bf16.msrb.mxu1 %v986_v13 }
  0x32   : > { %563 = vmatpush.bf16.msrb.mxu2 %v993_v55  ;;  %603 = vmatpush.bf16.msrb.mxu3 %v990_v56 }
  0x33   : > { %911 = vmatmul.msk.bf16.vlgmr.msrb.gmra.mxu0 %vm338_vm0, %v281_v15 }
  0x34   : > { %912 = vmatmul.msk.bf16.vlgmr.msrb.gmra.mxu1 %vm338_vm0, %v287_v19  ;;  %640 = vmatpush.bf16.msra.mxu0 %v634_v48 }
  0x35   : > { %654 = vmatpush.bf16.msra.mxu1 %v554_v46 }
  0x36   : > { %667 = vmatpush.bf16.msra.mxu2 %v594_v47  ;;  %683 = vmatpush.bf16.msra.mxu3 %v634_v48 }
  0x38   : > { %641 = vmatpush.bf16.msra.mxu0 %v998_v51 }
  0x39   : > { %655 = vmatpush.bf16.msra.mxu1 %v995_v49 }
  0x3a   : > { %668 = vmatpush.bf16.msra.mxu2 %v992_v50  ;;  %684 = vmatpush.bf16.msra.mxu3 %v998_v51 }
  0x3c   : > { %642 = vmatpush.bf16.msra.mxu0 %v997_v54 }
  0x3d   : > { %656 = vmatpush.bf16.msra.mxu1 %v994_v52 }
  0x3e   : > { %669 = vmatpush.bf16.msra.mxu2 %v991_v53  ;;  %685 = vmatpush.bf16.msra.mxu3 %v997_v54 }
  0x40   : > { %643 = vmatpush.bf16.msra.mxu0 %v996_v57 }
  0x41   : > { %657 = vmatpush.bf16.msra.mxu1 %v993_v55 }
  0x42   : > { %670 = vmatpush.bf16.msra.mxu2 %v990_v56  ;;  %686 = vmatpush.bf16.msra.mxu3 %v996_v57 }
  0x44   : > { %726 = vmatpush.msrb.mxu0 %v709_v7 }
  0x45   : > { %755 = vmatpush.msrb.mxu1 %v973_v8 }
  0x46   : > { %727 = vmatpush.msrb.mxu0 %v708_v9 }
  0x47   : > { %756 = vmatpush.msrb.mxu1 %v972_v10 }
  0x48   : > { %728 = vmatpush.msrb.mxu0 %v707_v11 }
  0xa0   : > { %v351_v20 = vpop.f32.mrf.mxu0 }
  0xa1   : > { %v391_v21 = vpop.f32.mrf.mxu1 }
  0xa2   : > { %v392_v30 = vadd.f32 %v391_v21, %v351_v20 }
  0xa6   : > { %v445_v23 = vpop.f32.mrf.mxu3 }
  0xa8   : > { %v431_v22 = vpop.f32.mrf.mxu2  ;;  %v353_v24 = vpop.f32.mrf.mxu0 }
  0xa9   : > { %v393_v25 = vpop.f32.mrf.mxu1  ;;  %v435_v32 = vadd.f32 %v431_v22, %v392_v30  ;;  %v706_v30 = vld [vmem:[%s1349_s5] sm:$0xff] }
  0xaa   : > { %729 = vmatpush.msrb.mxu0 %v706_v30 }
  0xae   : > { %v447_v26 = vpop.f32.mrf.mxu3 }
  0xb0   : > { %v433_v27 = vpop.f32.mrf.mxu2  ;;  %v458_v28 = vpop.f32.mrf.mxu0 }
  0xb1   : > { %v474_v29 = vpop.f32.mrf.mxu1  ;;  %v459_v31 = vadd.f32 %v458_v28, %v445_v23 }
  0xb3   : > { %v478_v33 = vadd.f32 %v474_v29, %v459_v31  ;;  %v971_v29 = vld [vmem:[%s1349_s5 + $0x28] sm:$0xff]  ;;  %v970_v31 = vld [vmem:[%s1349_s5 + $0x20] sm:$0xff] }
  0xb4   : > { %757 = vmatpush.msrb.mxu1 %v971_v29 }
  0xb5   : > { %v479_v34 = vmax.f32 %v435_v32, %v478_v33  ;;  %v1041_v32 = vld [vmem:[%s1348_s4] ss:$0 sm:$0xff] }
  0xb6   : > { %758 = vmatpush.msrb.mxu1 %v970_v31 }
  0xb7   : > { %481 = vrot.lane.b32.xlu0 %v479_v34, %s1106_s9  ;;  %s1056_s9 = sshra.s32 %s780_s13, 4  ;;  %s1057_s9 = int_to_ptr.hbm [resolvable:$true] %s1056_s9 }
  0xb8   : > { %v460_v35 = vpop.f32.mrf.mxu0  ;;  %s1058_s28 = scalar_lea.hbm %s1057_s9, 1  ;;  %p1063_p0 = scmp.lt.s32.totalorder %s1057_s9, %s1351_s7 }
  0xb9   : > { %v476_v36 = vpop.f32.mrf.mxu1  ;;  %p1059_p11 = scmp.ne.s32.totalorder %s1057_s9, %s1058_s28  ;;  %p1064_p1 = scmp.lt.s32.totalorder %s1062_s17, %s1058_s28 }
  0xbb   : > { %p1060_p12 = pnand %p1059_p11, %p1186_p5  ;;  %p1065_p2 = por %p1064_p1, %p1063_p0 }
  0xbd   : > { %p1061_p13 = pneg %p1060_p12 }
  0xbf   : > { %p1066_p3 = pnand %p1065_p2, %p1061_p13 }
 0x129   : > { %v482_v59 = vpop.permute.xlu0 %481 }
 0x12a   : > { %v484_v60 = vmax.f32 %v479_v34, %v482_v59 }
 0x12c   : > { %v489_v61 = vadd.f32 %v1040_v58, %v484_v60 }
 0x12e   : > { %v490_v62 = vmax.f32 %v489_v61, 0.0 }
 0x130   : > { %492 = vst.msk [vmem:[#allocation2] sm:$0x7f] %vm491_vm2, %v490_v62 }
 0x137   : > { %v496_v63 = vld [vmem:[#allocation2 + $0x1] ss:$2 sm:$0x3]  ;;  %v493_v0 = vld [vmem:[#allocation2] ss:$2 sm:$0x3] }
 0x138   : > { %v497_v1 = vpack.c.bf16 %v496_v63, %v496_v63  ;;  %v494_v2 = vpack.c.bf16 %v493_v0, %v493_v0  ;;  %v499_v3 = vld [vmem:[#allocation2 + $0x2] ss:$2 sm:$0x3]  ;;  %v502_v5 = vld [vmem:[#allocation2 + $0x3] ss:$2 sm:$0x3] }
 0x139   : > { %v500_v4 = vpack.c.bf16 %v499_v3, %v499_v3  ;;  %v503_v6 = vpack.c.bf16 %v502_v5, %v502_v5 }
 0x13a   : > { %939 = vmatmul.msk.bf16.vlgmr.msrb.gmra.mxu2 %vm548_vm3, %v497_v1  ;;  %952 = vmatmul.msk.bf16.vlgmr.msrb.gmra.mxu3 %vm548_vm3, %v494_v2 }
 0x13b   : > { %965 = vmatmul.msk.bf16.vlgmr.msra.gmra.mxu0 %vm548_vm3, %v500_v4  ;;  %966 = vmatmul.msk.bf16.vlgmr.msra.gmra.mxu1 %vm548_vm3, %v500_v4 }
 0x14a   : > { %967 = vmatmul.msk.bf16.vlgmr.msra.gmra.mxu2 %vm548_vm3, %v497_v1  ;;  %968 = vmatmul.msk.bf16.vlgmr.msra.gmra.mxu3 %vm548_vm3, %v503_v6 }
 0x1b8   : > { %v645_v12 = vpop.f32.mrf.mxu0  ;;  %v659_v13 = vpop.f32.mrf.mxu1 }
 0x1bd   : > { %v565_v14 = vpop.f32.mrf.mxu2  ;;  %v605_v15 = vpop.f32.mrf.mxu3 }
 0x1be   : > { %v606_v20 = vadd.f32 %v605_v15, %v565_v14 }
 0x1c0   : > { %v647_v16 = vpop.f32.mrf.mxu0  ;;  %v661_v17 = vpop.f32.mrf.mxu1  ;;  %v649_v24 = vadd.f32 %v645_v12, %v606_v20 }
 0x1c5   : > { %v567_v18 = vpop.f32.mrf.mxu2  ;;  %v607_v19 = vpop.f32.mrf.mxu3 }
 0x1cd   : > { %v672_v21 = vpop.f32.mrf.mxu2  ;;  %v688_v22 = vpop.f32.mrf.mxu3 }
 0x1ce   : > { %v673_v23 = vadd.f32 %v672_v21, %v659_v13 }
 0x1d0   : > { %v692_v25 = vadd.f32 %v688_v22, %v673_v23 }
 0x1d2   : > { %v693_v26 = vmax.f32 %v649_v24, %v692_v25 }
 0x1d4   : > { %695 = vrot.lane.b32.xlu0 %v693_v26, %s1107_s23 }
 0x1d5   : > { %v674_v27 = vpop.f32.mrf.mxu2  ;;  %v690_v28 = vpop.f32.mrf.mxu3 }
 0x246   : > { %v696_v33 = vpop.permute.xlu0 %695 }
 0x247   : > { %v698_v34 = vmax.f32 %v693_v26, %v696_v33 }
 0x249   : > { %v703_v35 = vadd.f32 %v1041_v32, %v698_v34 }
 0x24b   : > { %v704_v36 = vmax.f32 %v703_v35, 0.0 }
 0x24d   : > { %v740_v37 = vrot.slane %v704_v36, 1  ;;  %969 = vmatmul.msk.f32.vlgmr.msrb.gmra.mxu0 %vm710_vm4, %v704_v36 }
 0x24f   : > { %974 = vmatmul.msk.f32.vlgmr.msrb.gmra.mxu1 %vm710_vm4, %v740_v37 }
 0x2ca   : > { %v731_v39 = vpop.f32.mrf.mxu0 }
 0x2cb   : > { %v734_v40 = vadd.f32 %v731_v39, %v705_v38 }
 0x2cc   : > { %v760_v41 = vpop.f32.mrf.mxu1 }
 0x2cd   : > { %v763_v42 = vadd.f32 %v760_v41, %v734_v40 }
 0x2cf   : > { %765 = vst.msk [vmem:[%s270_s29] sm:$0x1] %vm764_vm5, %v763_v42 }
 0x2d0   : > { %1069 = shalt.err (!%p1066_p3)
}
 0x2d1   : > { %999 = dma.vmem_to_hbm [thread:$0]  (%p1186_p5), %s778_s8, 16, %s780_s13, %s767_s14  }
 0x2d2 PF: > { %p1005_p4 = scmp.ge.s32.totalorder %s1104_s27, 2  ;;  %s791_s18 = sand.u32 1, %s1092_s24  }
 0x2d3   : > { %s792_s21 = scalar_lea.sflag [#allocation4], %s791_s18 }
 0x2d4   : > { %p1002_p7 = pnand %p1005_p4, %p1190_p6 }
 0x2d6   : > { %p1003_p8 = pneg %p1002_p7 }
 0x2d8   : > { %1087 = dma.done.wait (%p1003_p8), %s792_s21, 16  }
 0x2d9   : > { %1089 = vsyncadd (%p1003_p8), %s792_s21, 4294967280  ;;  %p17_p9 = scmp.ge.s32.totalorder %s1173_s30, 4   ;;  %s1354_s24 = smov %s1096_s25 }
 0x2da   : > { %s1355_s25 = smov %s1100_s26  ;;  %s1356_s26 = smov %s1184_s10 }
 0x2db   : > { %s1357_s27 = smov %s1173_s30  ;;  %19 = sbr.rel (!%p17_p9) target bundleno = 3 (0x3), region = 94 }
 0x2e0   :  { %797 = vsyncpa [#allocation4], 1 }
 0x2e1   :  { %799 = vsyncpa [#allocation4 + $0x1], 1 }

</bundles_post_ra>
